<compile_context>
chip_gen: v6e
topology: v6e:2x2x1
jax: 0.10.0
libtpu: 0.0.40
codegen_flags: <defaults>
</compile_context>

<pallas_src>
import functools

import jax
import jax.numpy as jnp
from jax import lax
from jax.experimental import pallas as pl
from jax.experimental.pallas import tpu as pltpu


def _cvblock_kernel(x_ref, m1_ref, b1_ref, m2_ref, b2_ref, o_ref, *, img_h):
    # x_ref  : (Rt, W*Cin)          row-batched input slab (Rt/img_h images)
    # m1_ref : (3, W*Cin,  W*Cmid)  conv1 block-banded weights, bf16, BN1 folded
    # b1_ref : (1, W*Cmid)          BN1 bias (f32), tiled along W
    # m2_ref : (3, W*Cmid, W*Cout)  conv2 block-banded weights, bf16, BN2 folded
    # b2_ref : (1, W*Cout)          BN2 bias (f32), tiled along W
    # o_ref  : (Rt, W*Cout)         lane-dense output slab
    x = x_ref[...]                       # (Rt, W*Cin) f32
    rt = x.shape[0]

    def conv3x3_bn_relu(a, m_ref, b_ref):
        # a: (Rt, L_in) f32.  H-direction taps via XLU roll + per-image boundary
        # mask (row % img_h); W-direction taps + their zero padding are encoded
        # in the block-banded weight matrices.  Returns (Rt, L_out) f32.
        rowmod = lax.broadcasted_iota(jnp.int32, a.shape, 0) % img_h
        a_up = jnp.where(rowmod == 0, 0.0,
                         pltpu.roll(a, shift=1, axis=0))        # a[r-1], zero at top row
        a_dn = jnp.where(rowmod == img_h - 1, 0.0,
                         pltpu.roll(a, shift=rt - 1, axis=0))   # a[r+1], zero at bottom row
        acc = jnp.dot(a_up.astype(jnp.bfloat16), m_ref[0],
                      preferred_element_type=jnp.float32)
        acc += jnp.dot(a.astype(jnp.bfloat16), m_ref[1],
                       preferred_element_type=jnp.float32)
        acc += jnp.dot(a_dn.astype(jnp.bfloat16), m_ref[2],
                       preferred_element_type=jnp.float32)
        return jnp.maximum(acc + b_ref[...], 0.0)               # f32 epilogue

    y1 = conv3x3_bn_relu(x, m1_ref, b1_ref)                     # (Rt, W*Cmid)
    o_ref[...] = conv3x3_bn_relu(y1, m2_ref, b2_ref)            # (Rt, W*Cout)


def _band_weights(w, W):
    """Per-kh block-banded weight matrices for a 3x3 'SAME' conv.

    w: (3, 3, Cin, Cout) HWIO weights (BN scale already folded in, f32).
    Returns M: (3, W*Cin, W*Cout) with
      M[kh, w_in*Cin + ci, w_out*Cout + co] = w[kh, w_in - w_out + 1, ci, co]
    when |w_in - w_out| <= 1, else 0 (implements the zero padding in W).
    """
    _, _, cin, cout = w.shape
    w_in = jnp.arange(W)[:, None]     # (W, 1)
    w_out = jnp.arange(W)[None, :]    # (1, W)
    dw = w_in - w_out + 1             # (W, W)
    valid = (dw >= 0) & (dw <= 2)
    dw_c = jnp.clip(dw, 0, 2)
    m = w[:, dw_c, :, :]                                  # (3, W, W, Cin, Cout)
    m = jnp.where(valid[None, :, :, None, None], m, 0.0)
    m = jnp.transpose(m, (0, 1, 3, 2, 4))                 # (3, Win, Cin, Wout, Cout)
    return m.reshape(3, W * cin, W * cout)


def _pick_rows_per_tile(N, H, target_rows=256):
    """Rows per grid step: image-aligned multiple of H near `target_rows`,
    keeping >= 2 grid steps when N > 1 (v7x has 2 TensorCores)."""
    imgs = max(1, min(N, target_rows // max(H, 1)))
    if N > 1:
        imgs = min(imgs, max(1, N // 2))
    while N % imgs:
        imgs -= 1
    return imgs * H


def cvblock_pallas(x_nhwc, w1, s1, b1, w2, s2, b2, *, target_rows=256):
    """x_nhwc: (N, H, W, Cin) float32. Returns (N, H, W, Cout) float32."""
    N, H, W, cin = x_nhwc.shape
    cmid = w1.shape[3]
    cout = w2.shape[3]

    # Fold BN scale into the conv weights in f32, then cast to bf16 for the MXU.
    w1f = w1 * s1[None, None, None, :]
    w2f = w2 * s2[None, None, None, :]
    m1 = _band_weights(w1f, W).astype(jnp.bfloat16)       # (3, W*cin,  W*cmid)
    m2 = _band_weights(w2f, W).astype(jnp.bfloat16)       # (3, W*cmid, W*cout)
    b1t = jnp.tile(b1, W).reshape(1, W * cmid).astype(jnp.float32)
    b2t = jnp.tile(b2, W).reshape(1, W * cout).astype(jnp.float32)

    # Row-batched, lane-dense layout: rows = N*H, lanes = W*C (free row-major reshape).
    R = N * H
    x2 = x_nhwc.reshape(R, W * cin)

    rows_per_tile = _pick_rows_per_tile(N, H, target_rows)
    grid = (R // rows_per_tile,)

    grid_spec = pltpu.PrefetchScalarGridSpec(
        num_scalar_prefetch=0,
        grid=grid,
        in_specs=[
            pl.BlockSpec((rows_per_tile, W * cin), lambda r: (r, 0)),
            pl.BlockSpec((3, W * cin, W * cmid), lambda r: (0, 0, 0)),
            pl.BlockSpec((1, W * cmid), lambda r: (0, 0)),
            pl.BlockSpec((3, W * cmid, W * cout), lambda r: (0, 0, 0)),
            pl.BlockSpec((1, W * cout), lambda r: (0, 0)),
        ],
        out_specs=pl.BlockSpec((rows_per_tile, W * cout), lambda r: (r, 0)),
    )

    out = pl.pallas_call(
        functools.partial(_cvblock_kernel, img_h=H),
        out_shape=jax.ShapeDtypeStruct((R, W * cout), jnp.float32),
        grid_spec=grid_spec,
        compiler_params=pltpu.CompilerParams(
            dimension_semantics=("parallel",),
            vmem_limit_bytes=64 * 1024 * 1024,
        ),
    )(x2, m1, b1t, m2, b2t)

    return out.reshape(N, H, W, cout)


def _fold_bn(gamma, beta, running_mean, running_var, eps=1e-5):
    scale = gamma / jnp.sqrt(running_var + eps)
    bias = beta - running_mean * scale
    return scale, bias


def _reference(x_nhwc, w1, s1, b1, w2, s2, b2):
    dn = ("NHWC", "HWIO", "NHWC")
    y = lax.conv_general_dilated(x_nhwc, w1, (1, 1), "SAME",
                                 dimension_numbers=dn)
    y = jnp.maximum(y * s1 + b1, 0.0)
    y = lax.conv_general_dilated(y, w2, (1, 1), "SAME",
                                 dimension_numbers=dn)
    return jnp.maximum(y * s2 + b2, 0.0)


if __name__ == "__main__":
    key = jax.random.PRNGKey(0)
    N, Cin, H, W = 2, 4, 16, 16
    Cout = 8  # out_ch

    ks = jax.random.split(key, 10)
    # PyTorch-style input is NCHW; transpose to NHWC for the kernel.
    x_nchw = jax.random.normal(ks[0], (N, Cin, H, W), dtype=jnp.float32)
    x_nhwc = jnp.transpose(x_nchw, (0, 2, 3, 1))

    # Conv2d kernel_size=3, padding=1, bias=False weights (HWIO).
    w1 = jax.random.normal(ks[1], (3, 3, Cin, Cout), jnp.float32) * 0.2
    w2 = jax.random.normal(ks[2], (3, 3, Cout, Cout), jnp.float32) * 0.2
    # BatchNorm2d params + running stats (inference mode).
    g1 = 1.0 + 0.1 * jax.random.normal(ks[3], (Cout,), jnp.float32)
    be1 = 0.1 * jax.random.normal(ks[4], (Cout,), jnp.float32)
    rm1 = 0.1 * jax.random.normal(ks[5], (Cout,), jnp.float32)
    rv1 = jnp.abs(jax.random.normal(ks[6], (Cout,), jnp.float32)) + 0.5
    g2 = 1.0 + 0.1 * jax.random.normal(ks[7], (Cout,), jnp.float32)
    be2 = 0.1 * jax.random.normal(ks[8], (Cout,), jnp.float32)
    rm2 = 0.1 * jax.random.normal(ks[9], (Cout,), jnp.float32)
    rv2 = jnp.abs(jax.random.normal(ks[0], (Cout,), jnp.float32)) + 0.5

    s1, b1 = _fold_bn(g1, be1, rm1, rv1)
    s2, b2 = _fold_bn(g2, be2, rm2, rv2)

    out = cvblock_pallas(x_nhwc, w1, s1, b1, w2, s2, b2)
    out = jax.block_until_ready(out)

    ref = _reference(x_nhwc, w1, s1, b1, w2, s2, b2)
    assert out.shape == (N, H, W, Cout)
    # Tolerance covers bf16 MXU inputs (f32 accumulation) vs the f32 reference.
    assert jnp.allclose(out, ref, atol=5e-2, rtol=5e-2), "mismatch vs reference"

    print("KERNEL_OK")
</pallas_src>

<mosaic_0001>
module attributes {stable_mosaic.version = 11 : i64} {
  func.func @_cvblock_kernel(%arg0: i32, %arg1: memref<16x64xf32, #tpu.memory_space<vmem>>, %arg2: memref<3x64x128xbf16, #tpu.memory_space<vmem>>, %arg3: memref<1x128xf32, #tpu.memory_space<vmem>>, %arg4: memref<3x128x128xbf16, #tpu.memory_space<vmem>>, %arg5: memref<1x128xf32, #tpu.memory_space<vmem>>, %arg6: memref<16x128xf32, #tpu.memory_space<vmem>>) attributes {dimension_semantics = [#tpu.dimension_semantics<parallel>], iteration_bounds = array<i64: 2>, scalar_prefetch = 0 : i64, scratch_operands = 0 : i64, tpu.core_type = #tpu.core_type<tc>, window_params = [{transform_indices = @transform_0, window_bounds = array<i64: 16, 64>}, {pipeline_mode = #tpu.pipeline_mode<synchronous>, transform_indices = @transform_1, window_bounds = array<i64: 3, 64, 128>}, {pipeline_mode = #tpu.pipeline_mode<synchronous>, transform_indices = @transform_2, window_bounds = array<i64: 1, 128>}, {pipeline_mode = #tpu.pipeline_mode<synchronous>, transform_indices = @transform_3, window_bounds = array<i64: 3, 128, 128>}, {pipeline_mode = #tpu.pipeline_mode<synchronous>, transform_indices = @transform_4, window_bounds = array<i64: 1, 128>}, {transform_indices = @transform_5, window_bounds = array<i64: 16, 128>}]} {
    %c0 = arith.constant 0 : index
    %c0_0 = arith.constant 0 : index
    %0 = vector.load %arg1[%c0, %c0_0] : memref<16x64xf32, #tpu.memory_space<vmem>>, vector<16x64xf32>
    %1 = tpu.iota {dimensions = array<i32: 0>} : vector<16x64xi32>
    %c16_i32 = arith.constant 16 : i32
    %c0_i32 = arith.constant 0 : i32
    %2 = arith.cmpi eq, %c16_i32, %c0_i32 : i32
    %c1_i32 = arith.constant 1 : i32
    %3 = arith.select %2, %c1_i32, %c16_i32 : i32
    %4 = vector.broadcast %3 : i32 to vector<16x64xi32>
    %5 = arith.remsi %1, %4 : vector<16x64xi32>
    %c0_i32_1 = arith.constant 0 : i32
    %6 = vector.broadcast %c0_i32_1 : i32 to vector<16x64xi32>
    %7 = arith.cmpi ne, %5, %6 : vector<16x64xi32>
    %c0_i32_2 = arith.constant 0 : i32
    %8 = vector.broadcast %c0_i32_2 : i32 to vector<16x64xi32>
    %9 = arith.cmpi slt, %5, %8 : vector<16x64xi32>
    %c0_i32_3 = arith.constant 0 : i32
    %10 = arith.cmpi slt, %3, %c0_i32_3 : i32
    %11 = vector.broadcast %10 : i1 to vector<16x64xi1>
    %12 = vector.broadcast %11 : vector<16x64xi1> to vector<16x64xi1>
    %13 = arith.xori %9, %12 : vector<16x64xi1>
    %14 = arith.andi %13, %7 : vector<16x64xi1>
    %15 = vector.broadcast %3 : i32 to vector<16x64xi32>
    %16 = arith.addi %5, %15 : vector<16x64xi32>
    %17 = arith.select %14, %16, %5 : vector<16x64xi1>, vector<16x64xi32>
    %c0_i32_4 = arith.constant 0 : i32
    %18 = vector.broadcast %c0_i32_4 : i32 to vector<16x64xi32>
    %19 = arith.cmpi eq, %17, %18 : vector<16x64xi32>
    %c1_i32_5 = arith.constant 1 : i32
    %20 = tpu.dynamic_rotate %0 by %c1_i32_5 dim 0 : vector<16x64xf32>, i32 -> vector<16x64xf32>
    %cst = arith.constant 0.000000e+00 : f32
    %21 = vector.broadcast %cst : f32 to vector<16x64xf32>
    %22 = arith.select %19, %21, %20 : vector<16x64xi1>, vector<16x64xf32>
    %c15_i32 = arith.constant 15 : i32
    %23 = vector.broadcast %c15_i32 : i32 to vector<16x64xi32>
    %24 = arith.cmpi eq, %17, %23 : vector<16x64xi32>
    %c15_i32_6 = arith.constant 15 : i32
    %25 = tpu.dynamic_rotate %0 by %c15_i32_6 dim 0 : vector<16x64xf32>, i32 -> vector<16x64xf32>
    %cst_7 = arith.constant 0.000000e+00 : f32
    %26 = vector.broadcast %cst_7 : f32 to vector<16x64xf32>
    %27 = arith.select %24, %26, %25 : vector<16x64xi1>, vector<16x64xf32>
    %28 = arith.truncf %22 : vector<16x64xf32> to vector<16x64xbf16>
    %c0_8 = arith.constant 0 : index
    %c0_9 = arith.constant 0 : index
    %c0_10 = arith.constant 0 : index
    %29 = vector.load %arg2[%c0_8, %c0_9, %c0_10] : memref<3x64x128xbf16, #tpu.memory_space<vmem>>, vector<1x64x128xbf16>
    %30 = vector.shape_cast %29 : vector<1x64x128xbf16> to vector<64x128xbf16>
    %cst_11 = arith.constant dense<0.000000e+00> : vector<16x128xf32>
    %31 = tpu.matmul %28, %30, %cst_11 {dimension_numbers = #tpu.dot_dimension_numbers<[1], [0], [0], [1], [0, 0, 1, 1], [], []>} : vector<16x64xbf16>, vector<64x128xbf16>, vector<16x128xf32> -> vector<16x128xf32>
    %32 = arith.truncf %0 : vector<16x64xf32> to vector<16x64xbf16>
    %c1 = arith.constant 1 : index
    %c0_12 = arith.constant 0 : index
    %c0_13 = arith.constant 0 : index
    %33 = vector.load %arg2[%c1, %c0_12, %c0_13] : memref<3x64x128xbf16, #tpu.memory_space<vmem>>, vector<1x64x128xbf16>
    %34 = vector.shape_cast %33 : vector<1x64x128xbf16> to vector<64x128xbf16>
    %cst_14 = arith.constant dense<0.000000e+00> : vector<16x128xf32>
    %35 = tpu.matmul %32, %34, %cst_14 {dimension_numbers = #tpu.dot_dimension_numbers<[1], [0], [0], [1], [0, 0, 1, 1], [], []>} : vector<16x64xbf16>, vector<64x128xbf16>, vector<16x128xf32> -> vector<16x128xf32>
    %36 = arith.addf %31, %35 : vector<16x128xf32>
    %37 = arith.truncf %27 : vector<16x64xf32> to vector<16x64xbf16>
    %c2 = arith.constant 2 : index
    %c0_15 = arith.constant 0 : index
    %c0_16 = arith.constant 0 : index
    %38 = vector.load %arg2[%c2, %c0_15, %c0_16] : memref<3x64x128xbf16, #tpu.memory_space<vmem>>, vector<1x64x128xbf16>
    %39 = vector.shape_cast %38 : vector<1x64x128xbf16> to vector<64x128xbf16>
    %cst_17 = arith.constant dense<0.000000e+00> : vector<16x128xf32>
    %40 = tpu.matmul %37, %39, %cst_17 {dimension_numbers = #tpu.dot_dimension_numbers<[1], [0], [0], [1], [0, 0, 1, 1], [], []>} : vector<16x64xbf16>, vector<64x128xbf16>, vector<16x128xf32> -> vector<16x128xf32>
    %41 = arith.addf %36, %40 : vector<16x128xf32>
    %c0_18 = arith.constant 0 : index
    %c0_19 = arith.constant 0 : index
    %42 = vector.load %arg3[%c0_18, %c0_19] : memref<1x128xf32, #tpu.memory_space<vmem>>, vector<1x128xf32>
    %43 = vector.broadcast %42 : vector<1x128xf32> to vector<16x128xf32>
    %44 = arith.addf %41, %43 : vector<16x128xf32>
    %cst_20 = arith.constant 0.000000e+00 : f32
    %45 = vector.broadcast %cst_20 : f32 to vector<16x128xf32>
    %46 = arith.maximumf %44, %45 : vector<16x128xf32>
    %47 = tpu.iota {dimensions = array<i32: 0>} : vector<16x128xi32>
    %c16_i32_21 = arith.constant 16 : i32
    %c0_i32_22 = arith.constant 0 : i32
    %48 = arith.cmpi eq, %c16_i32_21, %c0_i32_22 : i32
    %c1_i32_23 = arith.constant 1 : i32
    %49 = arith.select %48, %c1_i32_23, %c16_i32_21 : i32
    %50 = vector.broadcast %49 : i32 to vector<16x128xi32>
    %51 = arith.remsi %47, %50 : vector<16x128xi32>
    %c0_i32_24 = arith.constant 0 : i32
    %52 = vector.broadcast %c0_i32_24 : i32 to vector<16x128xi32>
    %53 = arith.cmpi ne, %51, %52 : vector<16x128xi32>
    %c0_i32_25 = arith.constant 0 : i32
    %54 = vector.broadcast %c0_i32_25 : i32 to vector<16x128xi32>
    %55 = arith.cmpi slt, %51, %54 : vector<16x128xi32>
    %c0_i32_26 = arith.constant 0 : i32
    %56 = arith.cmpi slt, %49, %c0_i32_26 : i32
    %57 = vector.broadcast %56 : i1 to vector<16x128xi1>
    %58 = vector.broadcast %57 : vector<16x128xi1> to vector<16x128xi1>
    %59 = arith.xori %55, %58 : vector<16x128xi1>
    %60 = arith.andi %59, %53 : vector<16x128xi1>
    %61 = vector.broadcast %49 : i32 to vector<16x128xi32>
    %62 = arith.addi %51, %61 : vector<16x128xi32>
    %63 = arith.select %60, %62, %51 : vector<16x128xi1>, vector<16x128xi32>
    %c0_i32_27 = arith.constant 0 : i32
    %64 = vector.broadcast %c0_i32_27 : i32 to vector<16x128xi32>
    %65 = arith.cmpi eq, %63, %64 : vector<16x128xi32>
    %c1_i32_28 = arith.constant 1 : i32
    %66 = tpu.dynamic_rotate %46 by %c1_i32_28 dim 0 : vector<16x128xf32>, i32 -> vector<16x128xf32>
    %cst_29 = arith.constant 0.000000e+00 : f32
    %67 = vector.broadcast %cst_29 : f32 to vector<16x128xf32>
    %68 = arith.select %65, %67, %66 : vector<16x128xi1>, vector<16x128xf32>
    %c15_i32_30 = arith.constant 15 : i32
    %69 = vector.broadcast %c15_i32_30 : i32 to vector<16x128xi32>
    %70 = arith.cmpi eq, %63, %69 : vector<16x128xi32>
    %c15_i32_31 = arith.constant 15 : i32
    %71 = tpu.dynamic_rotate %46 by %c15_i32_31 dim 0 : vector<16x128xf32>, i32 -> vector<16x128xf32>
    %cst_32 = arith.constant 0.000000e+00 : f32
    %72 = vector.broadcast %cst_32 : f32 to vector<16x128xf32>
    %73 = arith.select %70, %72, %71 : vector<16x128xi1>, vector<16x128xf32>
    %74 = arith.truncf %68 : vector<16x128xf32> to vector<16x128xbf16>
    %c0_33 = arith.constant 0 : index
    %c0_34 = arith.constant 0 : index
    %c0_35 = arith.constant 0 : index
    %75 = vector.load %arg4[%c0_33, %c0_34, %c0_35] : memref<3x128x128xbf16, #tpu.memory_space<vmem>>, vector<1x128x128xbf16>
    %76 = vector.shape_cast %75 : vector<1x128x128xbf16> to vector<128x128xbf16>
    %cst_36 = arith.constant dense<0.000000e+00> : vector<16x128xf32>
    %77 = tpu.matmul %74, %76, %cst_36 {dimension_numbers = #tpu.dot_dimension_numbers<[1], [0], [0], [1], [0, 0, 1, 1], [], []>} : vector<16x128xbf16>, vector<128x128xbf16>, vector<16x128xf32> -> vector<16x128xf32>
    %78 = arith.truncf %46 : vector<16x128xf32> to vector<16x128xbf16>
    %c1_37 = arith.constant 1 : index
    %c0_38 = arith.constant 0 : index
    %c0_39 = arith.constant 0 : index
    %79 = vector.load %arg4[%c1_37, %c0_38, %c0_39] : memref<3x128x128xbf16, #tpu.memory_space<vmem>>, vector<1x128x128xbf16>
    %80 = vector.shape_cast %79 : vector<1x128x128xbf16> to vector<128x128xbf16>
    %cst_40 = arith.constant dense<0.000000e+00> : vector<16x128xf32>
    %81 = tpu.matmul %78, %80, %cst_40 {dimension_numbers = #tpu.dot_dimension_numbers<[1], [0], [0], [1], [0, 0, 1, 1], [], []>} : vector<16x128xbf16>, vector<128x128xbf16>, vector<16x128xf32> -> vector<16x128xf32>
    %82 = arith.addf %77, %81 : vector<16x128xf32>
    %83 = arith.truncf %73 : vector<16x128xf32> to vector<16x128xbf16>
    %c2_41 = arith.constant 2 : index
    %c0_42 = arith.constant 0 : index
    %c0_43 = arith.constant 0 : index
    %84 = vector.load %arg4[%c2_41, %c0_42, %c0_43] : memref<3x128x128xbf16, #tpu.memory_space<vmem>>, vector<1x128x128xbf16>
    %85 = vector.shape_cast %84 : vector<1x128x128xbf16> to vector<128x128xbf16>
    %cst_44 = arith.constant dense<0.000000e+00> : vector<16x128xf32>
    %86 = tpu.matmul %83, %85, %cst_44 {dimension_numbers = #tpu.dot_dimension_numbers<[1], [0], [0], [1], [0, 0, 1, 1], [], []>} : vector<16x128xbf16>, vector<128x128xbf16>, vector<16x128xf32> -> vector<16x128xf32>
    %87 = arith.addf %82, %86 : vector<16x128xf32>
    %c0_45 = arith.constant 0 : index
    %c0_46 = arith.constant 0 : index
    %88 = vector.load %arg5[%c0_45, %c0_46] : memref<1x128xf32, #tpu.memory_space<vmem>>, vector<1x128xf32>
    %89 = vector.broadcast %88 : vector<1x128xf32> to vector<16x128xf32>
    %90 = arith.addf %87, %89 : vector<16x128xf32>
    %cst_47 = arith.constant 0.000000e+00 : f32
    %91 = vector.broadcast %cst_47 : f32 to vector<16x128xf32>
    %92 = arith.maximumf %90, %91 : vector<16x128xf32>
    %c0_48 = arith.constant 0 : index
    %c0_49 = arith.constant 0 : index
    %93 = vector.load %arg6[%c0_48, %c0_49] : memref<16x128xf32, #tpu.memory_space<vmem>>, vector<16x128xf32>
    tpu.vector_store %arg6[%c0_48, %c0_49], %92 {strides = array<i32>} : memref<16x128xf32, #tpu.memory_space<vmem>>, vector<16x128xf32>,
    return
  }
  func.func @transform_0(%arg0: i32) -> (i32, i32) {
    %c0_i32 = arith.constant 0 : i32
    %c0_i32_0 = arith.constant 0 : i32
    return %arg0, %c0_i32 : i32, i32
  }
  func.func @transform_1(%arg0: i32) -> (i32, i32, i32) {
    %c0_i32 = arith.constant 0 : i32
    %c0_i32_0 = arith.constant 0 : i32
    %c0_i32_1 = arith.constant 0 : i32
    %c0_i32_2 = arith.constant 0 : i32
    return %c0_i32, %c0_i32_0, %c0_i32_1 : i32, i32, i32
  }
  func.func @transform_2(%arg0: i32) -> (i32, i32) {
    %c0_i32 = arith.constant 0 : i32
    %c0_i32_0 = arith.constant 0 : i32
    %c0_i32_1 = arith.constant 0 : i32
    return %c0_i32, %c0_i32_0 : i32, i32
  }
  func.func @transform_3(%arg0: i32) -> (i32, i32, i32) {
    %c0_i32 = arith.constant 0 : i32
    %c0_i32_0 = arith.constant 0 : i32
    %c0_i32_1 = arith.constant 0 : i32
    %c0_i32_2 = arith.constant 0 : i32
    return %c0_i32, %c0_i32_0, %c0_i32_1 : i32, i32, i32
  }
  func.func @transform_4(%arg0: i32) -> (i32, i32) {
    %c0_i32 = arith.constant 0 : i32
    %c0_i32_0 = arith.constant 0 : i32
    %c0_i32_1 = arith.constant 0 : i32
    return %c0_i32, %c0_i32_0 : i32, i32
  }
  func.func @transform_5(%arg0: i32) -> (i32, i32) {
    %c0_i32 = arith.constant 0 : i32
    %c0_i32_0 = arith.constant 0 : i32
    return %arg0, %c0_i32 : i32, i32
  }
}

</mosaic_0001>

<bundles_post_ra>
// kernel: tpu_custom_call.1
= control target key start
LH: loop header
LB: loop body
LE: loop exit
PB: predicated region body
PF: predicated region fallthrough
CT: control target
= control target key end

     0   :  { %10 = vsyncpa [#allocation3], 0  ;;  %s1827_s0 = inlined_call_operand.hbm [shape: f32[32,64], index: 0, kind: input, shape index: {}]   ;;  %s1828_s1 = inlined_call_operand.hbm [shape: bf16[3,64,128], index: 1, kind: input, shape index: {}]   ;;  %s1829_s2 = inlined_call_operand.vmem [shape: f32[1,128], index: 2, kind: input, shape index: {}]   ;;  %s1830_s3 = inlined_call_operand.hbm [shape: bf16[3,128,128], index: 3, kind: input, shape index: {}]   ;;  %s1831_s4 = inlined_call_operand.vmem [shape: f32[1,128], index: 4, kind: input, shape index: {}]   ;;  %s1832_s5 = inlined_call_operand.hbm [shape: f32[32,128], index: 5, kind: output, shape index: {}]  }
   0x1   :  { %12 = vsyncpa [#allocation3 + $0x1], 0 }
   0x2   :  { %13 = vsyncpa [#allocation6], 0 }
   0x3   :  { %14 = vsyncpa [#allocation4], 0 }
   0x4   :  { %16 = vsyncpa [#allocation4 + $0x1], 0  ;;  %s1534_s18 = smov 0   ;;  %s1536_s19 = smov 0  }
   0x5   :  { %s1538_s20 = smov 0   ;;  %s1540_s21 = smov 0  }
   0x6 LB: > { %s1555_s22 = sadd.s32 4294967295, %s1489_s21   ;;  %s1022_s23 = sadd.s32 4294967294, %s1489_s21   ;;  %s1489_s21 = sphi %s1540_s21, %s1858_s21   ;;  %s1485_s20 = sphi %s1538_s20, %s1857_s20   ;;  %s1481_s19 = sphi %s1536_s19, %s1856_s19   ;;  %s1477_s18 = sphi %s1534_s18, %s1855_s18  }
   0x7   : > { %p42_p0 = scmp.ne.s32.totalorder %s1481_s19, %s1477_s18  ;;  %p1833_p1 = scmp.eq.s32.totalorder %s1555_s22, 0 }
   0x8   : > { %p156_p3 = scmp.eq.s32.totalorder %s1022_s23, 1  ;;  %p1023_p5 = scmp.ge.s32.totalorder %s1489_s21, 1 }
   0x9   : > { %p1564_p4 = por %p1833_p1, %p42_p0  ;;  %p163_p7 = scmp.lt.s32.totalorder %s1489_s21, 3 }
   0xa   : > { %p1569_p6 = por %p156_p3, %p42_p0  ;;  %s1491_s27 = smov [#allocation5]  }
   0xb   : > { %s1837_s24 = scalar_select %p1564_p4, 1, 0 }
   0xc   : > { %s1838_s25 = scalar_select %p1569_p6, 1, 0 }
   0xd   : > { %p1574_p8 = pnand %p1023_p5, %p163_p7  ;;  %s175_s28 = sshll.u32 %s1491_s27, 4  ;;  %s176_s28 = int_to_ptr.vmem [resolvable:$true] %s175_s28 }
   0xe   : > { %s1492_s30 = smov [#allocation7]   ;;  %s1352_s7 = scalar_lea.vmem %s176_s28, 1536 }
   0xf   : > { %s1839_s26 = scalar_select %p1574_p8, 1, 0 }
  0x10   : > { %p1241_p9 = pneg %p1574_p8  ;;  %s191_s6 = sshll.u32 %s1492_s30, 4  ;;  %s192_s6 = int_to_ptr.vmem [resolvable:$true] %s191_s6 }
  0x11   : > { %p1353_p13 = scmp.ne.s32.totalorder %s176_s28, %s1352_s7  ;;  %p1360_p5 = scmp.lt.s32.totalorder %s176_s28, %s176_s28 }
  0x12   : > { %p1583_p11 = pnand %p1241_p9, %p1833_p1  ;;  %p1361_p7 = scmp.lt.s32.totalorder %s1352_s7, %s1352_s7 }
  0x14   : > { %p1343_p12 = pneg %p1583_p11  ;;  %p1362_p10 = por %p1361_p7, %p1360_p5 }
  0x16   : > { %p1355_p0 = pnand %p1353_p13, %p1343_p12 }
  0x18   : > { %p1356_p3 = pneg %p1355_p0 }
  0x1a   : > { %p1363_p9 = pnand %p1362_p10, %p1356_p3 }
  0x1c   : > { %1366 = shalt.err (!%p1363_p9)
}
  0x1d   : > { %s1493_s8 = smov 64   ;;  %s1494_s9 = smov 4  }
  0x1e   : > { %1244 = dma.hbm_to_vmem [thread:$0]  (!%p1583_p11), %s1828_s1, 1536, %s176_s28, [#allocation6], %s1493_s8, %s1493_s8, %s1494_s9  }
  0x1f   : > { %s1378_s12 = scalar_lea.vmem %s192_s6, 3072  ;;  %p1386_p2 = scmp.lt.s32.totalorder %s192_s6, %s192_s6 }
  0x20   : > { %p1379_p1 = scmp.ne.s32.totalorder %s192_s6, %s1378_s12  ;;  %p1387_p6 = scmp.lt.s32.totalorder %s1378_s12, %s1378_s12 }
  0x22   : > { %p1381_p13 = pnand %p1379_p1, %p1343_p12  ;;  %p1388_p5 = por %p1387_p6, %p1386_p2 }
  0x24   : > { %p1382_p0 = pneg %p1381_p13 }
  0x26   : > { %p1389_p10 = pnand %p1388_p5, %p1382_p0 }
  0x28   : > { %1392 = shalt.err (!%p1389_p10)
}
  0x29   : > { %1247 = dma.hbm_to_vmem [thread:$0]  (!%p1583_p11), %s1830_s3, 3072, %s192_s6, [#allocation6], %s1493_s8, %s1493_s8, %s1494_s9  }
  0x2a   : > { %s1606_s15 = sadd.s32 1, %s1489_s21   ;;  %s29_s16 = sadd.s32 1, %s1485_s20 }
  0x2b   : > { %s26_s17 = ssub.s32 %s1489_s21, %s1606_s15  ;;  %p36_p1 = scmp.ne.s32.totalorder %s1485_s20, %s1481_s19 }
  0x2c   : > { %p27_p2 = scmp.eq.s32.totalorder %s26_s17, 0  ;;  %p37_p6 = scmp.eq.s32.totalorder %s1489_s21, 0 }
  0x2d   : > { %p1841_p12 = scmp.eq.s32.totalorder %s1555_s22, 1  ;;  %p1258_p7 = scmp.lt.s32.totalorder %s1489_s21, 2 }
  0x2e   : > { %s1622_s27 = scalar_select %p27_p2, %s1485_s20, %s29_s16  }
  0x2f   : > { %p1616_p3 = por %p1841_p12, %p36_p1  ;;  %p38_p9 = por %p37_p6, %p36_p1 }
  0x30   : > { %s208_s28 = sand.u32 1, %s1485_s20   ;;  %s1089_s30 = sshll.u32 %s1489_s21, 8 }
  0x31   : > { %s1842_s23 = scalar_select %p1616_p3, 1, 0 }
  0x32   : > { %s1027_s29 = sshll.u32 %s208_s28, 4  ;;  %s1629_s8 = scalar_lea.hbm %s1827_s0, %s1089_s30 }
  0x33   : > { %s212_s9 = scalar_lea.vmem [#allocation2], %s1027_s29  ;;  %p1633_p11 = pnand %p1258_p7, %p38_p9 }
  0x34   : > { %s219_s10 = sshll.u32 %s212_s9, 4  ;;  %s1637_s12 = scalar_lea.sflag [#allocation3], %s208_s28  ;;  %s1631_s10 = int_to_ptr.vmem [resolvable:$true] %s219_s10 }
  0x35   : > { %s1393_s13 = scalar_lea.hbm %s1629_s8, 256  ;;  %p1395_p0 = pneg %p1633_p11 }
  0x36   : > { %p1394_p13 = scmp.ne.s32.totalorder %s1629_s8, %s1393_s13  ;;  %s1398_s17 = scalar_lea.hbm %s1827_s0, 512 }
  0x37   : > { %p1399_p1 = scmp.lt.s32.totalorder %s1629_s8, %s1827_s0  ;;  %p1400_p2 = scmp.lt.s32.totalorder %s1398_s17, %s1393_s13 }
  0x38   : > { %p1396_p5 = pnand %p1395_p0, %p1394_p13 }
  0x39   : > { %p1401_p6 = por %p1400_p2, %p1399_p1 }
  0x3a   : > { %p1397_p10 = pneg %p1396_p5 }
  0x3c   : > { %p1402_p12 = pnand %p1401_p6, %p1397_p10 }
  0x3e   : > { %1405 = shalt.err (!%p1402_p12)
}
  0x3f   : > { %s1406_s28 = scalar_lea.vmem %s1631_s10, 256  ;;  %s1495_s6 = smov [#allocation2]  }
  0x40   : > { %p1407_p7 = scmp.ne.s32.totalorder %s1631_s10, %s1406_s28  ;;  %s1411_s7 = sshll.u32 %s1495_s6, 4  ;;  %s1412_s7 = int_to_ptr.vmem [resolvable:$false] %s1411_s7 }
  0x41   : > { %s1413_s9 = scalar_lea.vmem %s1412_s7, 512  ;;  %p1414_p5 = scmp.lt.s32.totalorder %s1631_s10, %s1412_s7 }
  0x42   : > { %p1409_p9 = pnand %p1407_p7, %p1395_p0  ;;  %p1415_p3 = scmp.lt.s32.totalorder %s1413_s9, %s1406_s28 }
  0x44   : > { %p1410_p13 = pneg %p1409_p9  ;;  %p1416_p4 = por %p1415_p3, %p1414_p5 }
  0x46   : > { %p1417_p8 = pnand %p1416_p4, %p1410_p13 }
  0x48   : > { %1420 = shalt.err (!%p1417_p8)
}
  0x49   : > { %s1496_s13 = smov 128   ;;  %s1497_s14 = smov 8  }
  0x4a   : > { %1251 = dma.hbm_to_vmem [thread:$0]  (!%p1633_p11), %s1629_s8, 256, %s1631_s10, %s1637_s12, %s1496_s13, %s1496_s13, %s1497_s14  }
  0x4b   : > { %p1844_p0 = scmp.ne.s32.totalorder %s1839_s26, 0 }
  0x4c   : > { %s1661_s16 = sand.u32 (!%p1844_p0), 1, %s1481_s19   ;;  %p1845_p4 = scmp.ne.s32.totalorder (!%p1844_p0), %s1837_s24, 0 }
  0x4d   : > { %231 = sbr.rel (%p1844_p0) target bundleno = 574 (0x23e), region = 40  ;;  %s1031_s17 = sshll.u32 (!%p1844_p0), %s1661_s16, 4 }
  0x4e   : > { %s234_s29 = scalar_lea.sflag (!%p1844_p0), [#allocation3], %s1661_s16  ;;  %s1667_s30 = scalar_lea.vmem (!%p1844_p0), [#allocation2], %s1031_s17 }
  0x52   : > { %1464 = dma.done.wait (%p1845_p4), %s234_s29, 256  }
  0x53   : > { %1466 = vsyncadd (%p1845_p4), %s234_s29, 4294967040  ;;  %p1846_p8 = scmp.eq.s32.totalorder %s1555_s22, 0 }
  0x55   : > { %1468 = dma.done.wait (%p1846_p8), [#allocation6], 4608   ;;  %p1847_p3 = pmov %p1846_p8 }
  0x56   : > { %v1498_v0 = vmov 0.0   ;;  %vm1499_vm0 = vmmov 0   ;;  %v277_v1 = vlaneseq  ;;  %v1305_v2 = vld [vmem:[#allocation5 + $0x38] sm:$0xff]   ;;  %v1307_v5 = vld [vmem:[#allocation5 + $0x30] sm:$0xff]   ;;  %v1309_v9 = vld [vmem:[#allocation5 + $0x28] sm:$0xff]   ;;  %vm365_vm5 = vcmask 523264  }
  0x57   : > { %1470 = vsyncadd (%p1847_p3), [#allocation6], 4294962688  ;;  %1133 = vmatprep.subr.bf16.mxu0 %v1498_v0  ;;  %1145 = vmatprep.subr.bf16.mxu1 %v1498_v0  ;;  %v1306_v4 = vld [vmem:[#allocation5 + $0x18] sm:$0xff]   ;;  %v1308_v6 = vld [vmem:[#allocation5 + $0x10] sm:$0xff]   ;;  %vm1500_vm7 = vmmov 1   ;;  %s271_s11 = scalar_lea.vmem [#allocation8], %s1031_s17 }
  0x58   : > { %1141 = vmatprep.mubr.msk.bf16.mxu0 %vm1499_vm0, %v1498_v0  ;;  %1153 = vmatprep.mubr.msk.bf16.mxu1 %vm1499_vm0, %v1498_v0  ;;  %v1683_v3 = vshrl.u32 %v277_v1, 7  ;;  %v1310_v10 = vld [vmem:[#allocation5 + $0x8] sm:$0xff]   ;;  %v275_v12 = vld [vmem:[%s1667_s30] sm:$0xff]  ;;  %v1313_v27 = vld [vmem:[#allocation5 + $0x58] sm:$0xff]   ;;  %s930_s12 = sshll.u32 %s271_s11, 4  ;;  %s1090_s28 = sshll.u32 %s1555_s22, 8  ;;  %s1779_s12 = int_to_ptr.vmem [resolvable:$true] %s930_s12 }
  0x59   : > { %1134 = vmatpush3.bf16.msra.mxu0 %v1305_v2  ;;  %1146 = vmatpush3.bf16.msra.mxu1 %v1306_v4  ;;  %v276_v13 = vld [vmem:[%s1667_s30 + $0x8] sm:$0xff]  ;;  %v306_v15 = vrot.slane %v275_v12, 7  ;;  %v315_v17 = vrot.slane %v275_v12, 1  ;;  %v1311_v19 = vld [vmem:[#allocation5 + $0x20] sm:$0xff]   ;;  %v1314_v31 = vld [vmem:[#allocation5 + $0x50] sm:$0xff]   ;;  %s1784_s9 = scalar_lea.hbm %s1832_s5, %s1090_s28  ;;  %s917_s13 = scalar_lea.sflag [#allocation4], %s1661_s16 }
  0x5a   : > { %1135 = vmatprep.subr.bf16.mxu0 %v1498_v0  ;;  %v279_v7 = vadd.s32 8, %v1683_v3  ;;  %1147 = vmatprep.subr.bf16.mxu1 %v1498_v0  ;;  %v284_v8 = vand.u32 15, %v1683_v3  ;;  %vm308_vm1 = vcmp.lt.s32.totalorder %v1683_v3, 1  ;;  %vm317_vm3 = vcmp.lt.s32.totalorder %v1683_v3, 7  ;;  %v1312_v20 = vld [vmem:[#allocation5] sm:$0xff]   ;;  %v1317_v30 = vld [vmem:[#allocation7 + $0x78] sm:$0xff]  }
  0x5b   : > { %v307_v16 = vrot.slane %v276_v13, 7  ;;  %v316_v18 = vrot.slane %v276_v13, 1  ;;  %v331_v26 = vpack.c.bf16 %v276_v13, %v275_v12  ;;  %v1315_v32 = vld [vmem:[#allocation5 + $0x48] sm:$0xff]   ;;  %v1316_v33 = vld [vmem:[#allocation5 + $0x40] sm:$0xff]   ;;  %v1318_v36 = vld [vmem:[#allocation7 + $0x70] sm:$0xff]   ;;  %s1421_s14 = scalar_lea.vmem %s1779_s12, 256 }
  0x5c   : > { %v291_v11 = vand.u32 15, %v279_v7  ;;  %vm1694_vm2 = vcmp.eq.s32.totalorder %v284_v8, 0  ;;  %v1319_v37 = vld [vmem:[#allocation7 + $0x38] sm:$0xff]   ;;  %v1320_v38 = vld [vmem:[#allocation7 + $0x68] sm:$0xff]   ;;  %v1321_v39 = vld [vmem:[#allocation7 + $0x30] sm:$0xff]   ;;  %p1422_p11 = scmp.ne.s32.totalorder %s1779_s12, %s1421_s14  ;;  %p1852_p10 = scmp.ne.s32.totalorder %s1842_s23, 0 }
  0x5d   : > { %1136 = vmatpush3.bf16.msra.mxu0 %v1307_v5  ;;  %1148 = vmatpush3.bf16.msra.mxu1 %v1308_v6  ;;  %v309_v21 = vsel %vm308_vm1, %v306_v15, %v307_v16  ;;  %v310_v22 = vsel %vm308_vm1, %v307_v16, %v306_v15  ;;  %v319_v25 = vsel %vm317_vm3, %v316_v18, %v315_v17  ;;  %v1322_v40 = vld [vmem:[#allocation7 + $0x60] sm:$0xff]   ;;  %v1323_v41 = vld [vmem:[#allocation7 + $0x28] sm:$0xff]   ;;  %v1324_v42 = vld [vmem:[#allocation7 + $0x58] sm:$0xff]   ;;  %s1501_s22 = smov [#allocation8]  }
  0x5e   : > { %1137 = vmatprep.subr.bf16.mxu0 %v1498_v0  ;;  %1149 = vmatprep.subr.bf16.mxu1 %v1498_v0  ;;  %vm1704_vm4 = vcmp.eq.s32.totalorder %v291_v11, 15  ;;  %v311_v24 = vsel %vm1694_vm2, 0.0, %v310_v22  ;;  %v318_v34 = vsel %vm317_vm3, %v315_v17, %v316_v18  ;;  %v1325_v43 = vld [vmem:[#allocation7 + $0x20] sm:$0xff]   ;;  %v1326_v44 = vld [vmem:[#allocation7 + $0x50] sm:$0xff]   ;;  %v1327_v45 = vld [vmem:[#allocation7 + $0x18] sm:$0xff]   ;;  %p1423_p1 = pnand %p1422_p11, %p1852_p10  ;;  %s1425_s17 = sshll.u32 %s1501_s22, 4  ;;  %s1426_s17 = int_to_ptr.vmem [resolvable:$false] %s1425_s17 }
  0x5f   : > { %v322_v28 = vpack.c.bf16 %v309_v21, %v311_v24  ;;  %v321_v29 = vsel %vm1704_vm4, 0.0, %v319_v25  ;;  %v1328_v46 = vld [vmem:[#allocation7 + $0x48] sm:$0xff]   ;;  %v1329_v47 = vld [vmem:[#allocation7 + $0x10] sm:$0xff]   ;;  %v1330_v48 = vld [vmem:[#allocation7 + $0x40] sm:$0xff]   ;;  %s1427_s29 = scalar_lea.vmem %s1426_s17, 512  ;;  %p1428_p6 = scmp.lt.s32.totalorder %s1779_s12, %s1426_s17 }
  0x60   : > { %v478_v35 = vpack.c.bf16 %v321_v29, %v318_v34  ;;  %v1331_v49 = vld [vmem:[#allocation7 + $0x8] sm:$0xff]   ;;  %v1332_v50 = vld [vmem:[#allocation7] sm:$0xff]   ;;  %vm1067_vm6 = vmneg %vm1694_vm2  ;;  %p1424_p2 = pneg %p1423_p1  ;;  %p1429_p12 = scmp.lt.s32.totalorder %s1427_s29, %s1421_s14 }
  0x61   : > { %1138 = vmatpush3.bf16.msra.mxu0 %v1309_v9  ;;  %1150 = vmatpush3.bf16.msra.mxu1 %v1310_v10  ;;  %v1050_v61 = vld [vmem:[%s1829_s2] ss:$0 sm:$0xff]  ;;  %v1333_v10 = vld [vmem:[#allocation7 + $0xb8] sm:$0xff]   ;;  %vm1068_vm8 = vmpackc.low %vm1500_vm7, %vm1067_vm6 }
  0x62   : > { %1139 = vmatprep.subr.bf16.mxu0 %v1498_v0  ;;  %1151 = vmatprep.subr.bf16.mxu1 %v1498_v0  ;;  %v1334_v18 = vld [vmem:[#allocation7 + $0xb0] sm:$0xff]   ;;  %v1335_v14 = vld [vmem:[#allocation7 + $0xa8] sm:$0xff]   ;;  %vm1079_vm9 = vmneg %vm1704_vm4  ;;  %p1430_p7 = por %p1429_p12, %p1428_p6 }
  0x63   : > { %v1338_v21 = vld [vmem:[#allocation7 + $0x90] sm:$0xff]   ;;  %v1339_v22 = vld [vmem:[#allocation7 + $0x88] sm:$0xff]   ;;  %vm1080_vm10 = vmpackc.low %vm1079_vm9, %vm1500_vm7 }
  0x64   : > { %v1083_v3 = vld [vmem:[%s1831_s4] ss:$0 sm:$0xff]  ;;  %p1431_p9 = pnand %p1430_p7, %p1424_p2 }
  0x65   : > { %1140 = vmatpush3.bf16.msra.mxu0 %v1311_v19  ;;  %1152 = vmatpush3.bf16.msra.mxu1 %v1312_v20  ;;  %v1336_v19 = vld [vmem:[#allocation7 + $0xa0] sm:$0xff]   ;;  %v1337_v20 = vld [vmem:[#allocation7 + $0x98] sm:$0xff]  }
  0x66   : > { %1157 = vmatprep.subr.bf16.mxu0 %v1498_v0  ;;  %1169 = vmatprep.subr.bf16.mxu1 %v1498_v0 }
  0x68   : > { %1142 = vmatmul.mubr.msk.bf16.vlgmr.msra.gmra.mxu0 %vm365_vm5, %v331_v26  ;;  %1154 = vmatmul.mubr.msk.bf16.vlgmr.msra.gmra.mxu1 %vm365_vm5, %v322_v28  ;;  %v1340_v26 = vld [vmem:[#allocation7 + $0x80] sm:$0xff]  }
  0x69   : > { %1158 = vmatpush3.bf16.msra.mxu0 %v1313_v27  ;;  %1165 = vmatprep.mubr.msk.bf16.mxu0 %vm1499_vm0, %v1498_v0 }
  0x6a   : > { %1159 = vmatprep.subr.bf16.mxu0 %v1498_v0  ;;  %1170 = vmatpush3.bf16.msra.mxu1 %v1317_v30 }
  0x6b   : > { %1185 = vmatprep.mubr.msk.bf16.mxu1 %vm1499_vm0, %v1498_v0  ;;  %1171 = vmatprep.subr.bf16.mxu1 %v1498_v0 }
  0x6d   : > { %1160 = vmatpush3.bf16.msra.mxu0 %v1314_v31 }
  0x6e   : > { %1161 = vmatprep.subr.bf16.mxu0 %v1498_v0  ;;  %1172 = vmatpush3.bf16.msra.mxu1 %v1318_v36 }
  0x6f   : > { %1173 = vmatprep.subr.bf16.mxu1 %v1498_v0 }
  0x71   : > { %1162 = vmatpush3.bf16.msra.mxu0 %v1315_v32 }
  0x72   : > { %1163 = vmatprep.subr.bf16.mxu0 %v1498_v0  ;;  %1174 = vmatpush3.bf16.msra.mxu1 %v1320_v38 }
  0x73   : > { %1175 = vmatprep.subr.bf16.mxu1 %v1498_v0 }
  0x75   : > { %1164 = vmatpush3.bf16.msra.mxu0 %v1316_v33 }
  0x76   : > { %1189 = vmatprep.subr.bf16.mxu0 %v1498_v0  ;;  %1176 = vmatpush3.bf16.msra.mxu1 %v1322_v40 }
  0x77   : > { %1177 = vmatprep.subr.bf16.mxu1 %v1498_v0 }
  0x78   : > { %1166 = vmatmul.mubr.msk.bf16.vlgmr.msra.gmra.mxu0 %vm365_vm5, %v478_v35 }
  0x79   : > { %1205 = vmatprep.mubr.msk.bf16.mxu0 %vm1499_vm0, %v1498_v0  ;;  %1190 = vmatpush3.bf16.msra.mxu0 %v1319_v37 }
  0x7a   : > { %1191 = vmatprep.subr.bf16.mxu0 %v1498_v0  ;;  %1178 = vmatpush3.bf16.msra.mxu1 %v1324_v42 }
  0x7b   : > { %1179 = vmatprep.subr.bf16.mxu1 %v1498_v0 }
  0x7d   : > { %1192 = vmatpush3.bf16.msra.mxu0 %v1321_v39 }
  0x7e   : > { %1193 = vmatprep.subr.bf16.mxu0 %v1498_v0  ;;  %1180 = vmatpush3.bf16.msra.mxu1 %v1326_v44 }
  0x7f   : > { %1181 = vmatprep.subr.bf16.mxu1 %v1498_v0 }
  0x81   : > { %1194 = vmatpush3.bf16.msra.mxu0 %v1323_v41 }
  0x82   : > { %1195 = vmatprep.subr.bf16.mxu0 %v1498_v0  ;;  %1182 = vmatpush3.bf16.msra.mxu1 %v1328_v46 }
  0x83   : > { %1183 = vmatprep.subr.bf16.mxu1 %v1498_v0 }
  0x85   : > { %1196 = vmatpush3.bf16.msra.mxu0 %v1325_v43 }
  0x86   : > { %1197 = vmatprep.subr.bf16.mxu0 %v1498_v0  ;;  %1184 = vmatpush3.bf16.msra.mxu1 %v1330_v48 }
  0x87   : > { %1209 = vmatprep.subr.bf16.mxu1 %v1498_v0 }
  0x89   : > { %1198 = vmatpush3.bf16.msra.mxu0 %v1327_v45 }
  0x8a   : > { %1199 = vmatprep.subr.bf16.mxu0 %v1498_v0 }
  0x8d   : > { %1200 = vmatpush3.bf16.msra.mxu0 %v1329_v47 }
  0x8e   : > { %1201 = vmatprep.subr.bf16.mxu0 %v1498_v0 }
  0x91   : > { %1202 = vmatpush3.bf16.msra.mxu0 %v1331_v49 }
  0x92   : > { %1203 = vmatprep.subr.bf16.mxu0 %v1498_v0 }
  0x95   : > { %1204 = vmatpush3.bf16.msra.mxu0 %v1332_v50 }
 0x128   : > { %v403_v51 = vpop.f32.mrf.mxu0  ;;  %v471_v52 = vpop.f32.mrf.mxu1 }
 0x129   : > { %v472_v59 = vadd.f32 %v471_v52, %v403_v51 }
 0x12a   : > { %v1143_v53 = vpop.f32.mrf.mxu0  ;;  %v1155_v54 = vpop.f32.mrf.mxu1 }
 0x12c   : > { %v406_v55 = vpop.f32.mrf.mxu0  ;;  %v474_v56 = vpop.f32.mrf.mxu1 }
 0x12d   : > { %v475_v1 = vadd.f32 %v474_v56, %v406_v55 }
 0x12e   : > { %v1144_v57 = vpop.f32.mrf.mxu0  ;;  %v1156_v58 = vpop.f32.mrf.mxu1 }
 0x138   : > { %v549_v60 = vpop.f32.mrf.mxu0 }
 0x139   : > { %v556_v62 = vadd.f32 %v549_v60, %v472_v59 }
 0x13a   : > { %v1167_v63 = vpop.f32.mrf.mxu0 }
 0x13b   : > { %v565_v2 = vadd.f32 %v1050_v61, %v556_v62 }
 0x13c   : > { %v552_v4 = vpop.f32.mrf.mxu0 }
 0x13d   : > { %v557_v5 = vadd.f32 %v552_v4, %v475_v1  ;;  %v567_v7 = vmax.f32 %v565_v2, 0.0 }
 0x13e   : > { %v1168_v6 = vpop.f32.mrf.mxu0 }
 0x13f   : > { %v566_v8 = vadd.f32 %v1050_v61, %v557_v5  ;;  %v569_v11 = vrot.slane %v567_v7, 7  ;;  %v575_v25 = vrot.slane %v567_v7, 1 }
 0x141   : > { %v568_v9 = vmax.f32 %v566_v8, 0.0 }
 0x143   : > { %v570_v12 = vrot.slane %v568_v9, 7  ;;  %v598_v13 = vpack.c.bf16 %v568_v9, %v567_v7  ;;  %v576_v24 = vrot.slane %v568_v9, 1 }
 0x145   : > { %v571_v15 = vsel %vm308_vm1, %v569_v11, %v570_v12  ;;  %v572_v16 = vsel %vm308_vm1, %v570_v12, %v569_v11  ;;  %1186 = vmatmul.mubr.bf16.vlgmr.msra.gmra.mxu1 %v598_v13  ;;  %v577_v27 = vsel %vm317_vm3, %v575_v25, %v576_v24  ;;  %v578_v28 = vsel %vm317_vm3, %v576_v24, %v575_v25 }
 0x146   : > { %1210 = vmatpush3.bf16.msra.mxu1 %v1333_v10  ;;  %v1069_v17 = vpack.c.bf16 %v571_v15, %v572_v16  ;;  %1225 = vmatprep.mubr.msk.bf16.mxu1 %vm1499_vm0, %v1498_v0  ;;  %v1081_v29 = vpack.c.bf16 %v578_v28, %v577_v27 }
 0x147   : > { %1211 = vmatprep.subr.bf16.mxu1 %v1498_v0 }
 0x148   : > { %1206 = vmatmul.mubr.msk.bf16.vlgmr.msra.gmra.mxu0 %vm1068_vm8, %v1069_v17 }
 0x14a   : > { %1212 = vmatpush3.bf16.msra.mxu1 %v1334_v18 }
 0x14b   : > { %1213 = vmatprep.subr.bf16.mxu1 %v1498_v0 }
 0x14e   : > { %1214 = vmatpush3.bf16.msra.mxu1 %v1335_v14 }
 0x14f   : > { %1215 = vmatprep.subr.bf16.mxu1 %v1498_v0 }
 0x152   : > { %1216 = vmatpush3.bf16.msra.mxu1 %v1336_v19 }
 0x153   : > { %1217 = vmatprep.subr.bf16.mxu1 %v1498_v0 }
 0x156   : > { %1218 = vmatpush3.bf16.msra.mxu1 %v1337_v20 }
 0x157   : > { %1219 = vmatprep.subr.bf16.mxu1 %v1498_v0 }
 0x15a   : > { %1220 = vmatpush3.bf16.msra.mxu1 %v1338_v21 }
 0x15b   : > { %1221 = vmatprep.subr.bf16.mxu1 %v1498_v0 }
 0x15e   : > { %1222 = vmatpush3.bf16.msra.mxu1 %v1339_v22 }
 0x15f   : > { %1223 = vmatprep.subr.bf16.mxu1 %v1498_v0 }
 0x162   : > { %1224 = vmatpush3.bf16.msra.mxu1 %v1340_v26 }
 0x165   : > { %1226 = vmatmul.mubr.msk.bf16.vlgmr.msra.gmra.mxu1 %vm1080_vm10, %v1081_v29 }
 0x205   : > { %v698_v30 = vpop.f32.mrf.mxu1 }
 0x207   : > { %v1187_v31 = vpop.f32.mrf.mxu1 }
 0x208   : > { %v787_v32 = vpop.f32.mrf.mxu0 }
 0x209   : > { %v701_v33 = vpop.f32.mrf.mxu1  ;;  %v788_v36 = vadd.f32 %v787_v32, %v698_v30 }
 0x20a   : > { %v1207_v0 = vpop.f32.mrf.mxu0 }
 0x20b   : > { %v1188_v23 = vpop.f32.mrf.mxu1 }
 0x20c   : > { %v790_v34 = vpop.f32.mrf.mxu0 }
 0x20d   : > { %v791_v40 = vadd.f32 %v790_v34, %v701_v33 }
 0x20e   : > { %v1208_v35 = vpop.f32.mrf.mxu0 }
 0x225   : > { %v894_v37 = vpop.f32.mrf.mxu1 }
 0x226   : > { %v901_v38 = vadd.f32 %v894_v37, %v788_v36 }
 0x227   : > { %v1227_v39 = vpop.f32.mrf.mxu1 }
 0x228   : > { %v910_v41 = vadd.f32 %v1083_v3, %v901_v38 }
 0x229   : > { %v897_v42 = vpop.f32.mrf.mxu1 }
 0x22a   : > { %v912_v43 = vmax.f32 %v910_v41, 0.0  ;;  %v902_v44 = vadd.f32 %v897_v42, %v791_v40 }
 0x22b   : > { %v1228_v45 = vpop.f32.mrf.mxu1 }
 0x22c   : > { %914 = vst [vmem:[%s271_s11] sm:$0xff] %v912_v43  ;;  %v911_v46 = vadd.f32 %v1083_v3, %v902_v44 }
 0x22e   : > { %v913_v47 = vmax.f32 %v911_v46, 0.0 }
 0x230   : > { %915 = vst [vmem:[%s271_s11 + $0x8] sm:$0xff] %v913_v47 }
 0x231   : > { %1434 = shalt.err (!%p1431_p9)
}
 0x232   : > { %s1435_s30 = scalar_lea.hbm %s1784_s9, 256  ;;  %s1439_s8 = scalar_lea.hbm %s1832_s5, 512 }
 0x233   : > { %p1436_p13 = scmp.ne.s32.totalorder %s1784_s9, %s1435_s30  ;;  %p1440_p4 = scmp.lt.s32.totalorder %s1784_s9, %s1832_s5 }
 0x234   : > { %p1441_p8 = scmp.lt.s32.totalorder %s1439_s8, %s1435_s30 }
 0x235   : > { %p1437_p5 = pnand %p1436_p13, %p1852_p10 }
 0x236   : > { %p1442_p3 = por %p1441_p8, %p1440_p4 }
 0x237   : > { %p1438_p0 = pneg %p1437_p5 }
 0x239   : > { %p1443_p11 = pnand %p1442_p3, %p1438_p0 }
 0x23b   : > { %1446 = shalt.err (!%p1443_p11)
}
 0x23c   : > { %s1502_s28 = smov 128   ;;  %s1503_s6 = smov 8  }
 0x23d   : > { %1239 = dma.vmem_to_hbm [thread:$0]  (%p1852_p10), %s1779_s12, 256, %s1784_s9, %s917_s13, %s1502_s28, %s1502_s28, %s1503_s6  }
 0x23e PF: > { %s945_s7 = sand.u32 1, %s1477_s18   ;;  %p1853_p1 = scmp.ne.s32.totalorder %s1838_s25, 0 }
 0x23f   : > { %p1854_p2 = scmp.ge.s32.totalorder %s1489_s21, 2  ;;  %s946_s14 = scalar_lea.sflag [#allocation4], %s945_s7 }
 0x241   : > { %p1253_p6 = pnand %p1854_p2, %p1853_p1 }
 0x243   : > { %p1254_p12 = pneg %p1253_p6 }
 0x245   : > { %1472 = dma.done.wait (%p1254_p12), %s946_s14, 256  }
 0x246   : > { %1474 = vsyncadd (%p1254_p12), %s946_s14, 4294967040  ;;  %p19_p7 = scmp.ge.s32.totalorder %s1606_s15, 4   ;;  %s1855_s18 = smov %s1481_s19 }
 0x247   : > { %s1856_s19 = smov %s1485_s20  ;;  %s1857_s20 = smov %s1622_s27 }
 0x248   : > { %s1858_s21 = smov %s1606_s15  ;;  %21 = sbr.rel (!%p19_p7) target bundleno = 6 (0x6), region = 97 }
 0x24d   :  { %951 = vsyncpa [#allocation3], 1 }
 0x24e   :  { %953 = vsyncpa [#allocation3 + $0x1], 1 }
 0x24f   :  { %954 = vsyncpa [#allocation6], 1 }
 0x250   :  { %955 = vsyncpa [#allocation4], 1 }
 0x251   :  { %957 = vsyncpa [#allocation4 + $0x1], 1 }

</bundles_post_ra>
